<compile_context>
chip_gen: v7x
topology: tpu7x:2x2x1
jax: 0.10.0
libtpu: 0.0.40
codegen_flags: <defaults>
</compile_context>

<pallas_src>
import functools

import jax
import jax.numpy as jnp
from jax.experimental import pallas as pl
from jax.experimental.pallas import tpu as pltpu


def _round_up(x, m):
    return (x + m - 1) // m * m


def rmtpp_decoder_kernel(x_ref, w1_ref, b1_ref, wcat_ref, bcat_ref, out_ref,
                         *, num_marks):
    """Fused MLP -> sigmoid -> fused (time|mark) projection -> masked log_softmax.

    Output slab layout (lane-dense, width P = round_up(1+E, 128)):
      col 0      : time logit
      cols 1..E  : mark log-probabilities
      cols >E    : 0.0 filler (sliced away by the wrapper; safe if exposed)
    """
    x = x_ref[...]                                        # [TR, H] compute dtype

    # MLP: Linear(H -> M) + Sigmoid.  f32 accumulate on the MXU, f32 epilogue.
    h = jnp.dot(x, w1_ref[...], preferred_element_type=jnp.float32) + b1_ref[...]
    s = jax.nn.sigmoid(h)                                 # [TR, M] f32

    # Fused time+mark projection: one matmul into a lane-dense [TR, P] slab.
    fused = (jnp.dot(s.astype(wcat_ref.dtype), wcat_ref[...],
                     preferred_element_type=jnp.float32)
             + bcat_ref[...])                             # [TR, P] f32

    # Masked log_softmax over the mark columns (1..num_marks) only, so lane
    # padding never corrupts the normalizer.
    col = jax.lax.broadcasted_iota(jnp.int32, fused.shape, dimension=1)
    is_mark = (col >= 1) & (col <= num_marks)
    neg_inf = jnp.float32(-jnp.inf)
    masked = jnp.where(is_mark, fused, neg_inf)
    m_max = jnp.max(masked, axis=-1, keepdims=True)       # finite: marks exist
    shifted = masked - m_max                              # -inf off the marks
    lse = jnp.log(jnp.sum(jnp.exp(shifted), axis=-1, keepdims=True))
    log_probs = shifted - lse                             # -inf off the marks

    # col 0 = raw time logit, mark cols = log-probs, padding cols = 0.0.
    out = jnp.where(col == 0, fused, jnp.where(is_mark, log_probs, 0.0))
    out_ref[...] = out.astype(out_ref.dtype)


def pack_decoder_params(params, *, compute_dtype=jnp.bfloat16):
    """Build the fused/cast kernel parameters once (hoisted out of the forward).

    col 0 of the fused weight/bias carries the time projection, cols 1..E the
    mark projection, remaining lane-padding columns are zero.
    """
    w1, b1 = params["mlp_w"], params["mlp_b"]             # [H, M], [M]
    wt, bt = params["time_w"], params["time_b"]           # [M, 1], [1]
    wm, bm = params["mark_w"], params["mark_b"]           # [M, E], [E]
    M = w1.shape[1]
    E = wm.shape[1]
    P = _round_up(1 + E, 128)

    w_cat = jnp.zeros((M, P), jnp.float32)
    w_cat = w_cat.at[:, 0:1].set(wt.astype(jnp.float32))
    w_cat = w_cat.at[:, 1:1 + E].set(wm.astype(jnp.float32))
    b_cat = jnp.zeros((1, P), jnp.float32)
    b_cat = b_cat.at[:, 0:1].set(bt.reshape(1, 1).astype(jnp.float32))
    b_cat = b_cat.at[:, 1:1 + E].set(bm.reshape(1, E).astype(jnp.float32))

    return {
        "w1": w1.astype(compute_dtype),                    # [H, M]
        "b1": b1.reshape(1, M).astype(jnp.float32),        # [1, M] (f32 bias)
        "wcat": w_cat.astype(compute_dtype),               # [M, P]
        "bcat": b_cat,                                     # [1, P] (f32 bias)
        "num_marks": int(E),
        "intensity_b": params["intensity_b"],
    }


def rmtpp_decoder_forward(hidden_states, packed, *, row_tile=1024,
                          out_dtype=jnp.float32, single_buffer_weights=True):
    """hidden_states: [B, S, H]; packed: output of pack_decoder_params().

    Returns (time_logits [B,S,1], mark_logits [B,S,E], base_intensity scalar).
    Note: in a fused production graph, cast hidden_states to bf16 at the
    producer (or pass an already-bf16 encoder output) so the kernel reads half
    the bytes; the cast below is a no-op in that case.
    """
    B, S, H = hidden_states.shape
    w1, b1 = packed["w1"], packed["b1"]
    wcat, bcat = packed["wcat"], packed["bcat"]
    E = packed["num_marks"]
    compute_dtype = w1.dtype
    M = w1.shape[1]
    P = wcat.shape[1]
    R = B * S

    itemsize = jnp.dtype(compute_dtype).itemsize
    out_itemsize = jnp.dtype(out_dtype).itemsize
    g = 16 if itemsize < 4 else 8                          # sublane granularity

    # Row tiling: largest tile up to row_tile (multiple of g); ensure >=2 grid
    # steps when R allows so v7x's 2 TensorCores both get work (neutral on
    # single-TC v5e/v6e).  No host-side padding: the grid handles a partial
    # last block and padded rows never reach valid output rows.
    TR = min(row_tile, _round_up(R, g))
    if R <= TR and R > g:
        TR = _round_up(pl.cdiv(R, 2), g)
    num_tiles = pl.cdiv(R, TR)

    x2d = hidden_states.reshape(R, H).astype(compute_dtype)

    # VMEM budget: double-buffered x/out tiles + single-buffered weights + slack.
    vmem_bytes = (2 * TR * H * itemsize
                  + 2 * TR * P * out_itemsize
                  + (H * M + M * P) * itemsize
                  + (M + P) * 4
                  + (2 << 20))
    if not single_buffer_weights:
        vmem_bytes += (H * M + M * P) * itemsize           # weight double buffers
    try:
        phys_vmem = pltpu.get_tpu_info().vmem_capacity_bytes
    except Exception:  # pragma: no cover - conservative fallback
        phys_vmem = 64 << 20
    vmem_bytes = int(min(max(vmem_bytes, 4 << 20), int(phys_vmem * 0.85)))

    cost = pl.CostEstimate(
        flops=2 * R * H * M + 2 * R * M * P,
        transcendentals=R * M + R * P,                     # sigmoid + exp
        bytes_accessed=(R * H * itemsize + (H * M + M * P) * itemsize
                        + (M + P) * 4 + R * P * out_itemsize),
    )

    kernel = functools.partial(rmtpp_decoder_kernel, num_marks=E)

    def build(single_buffer):
        resident = dict(pipeline_mode=pl.Buffered(1)) if single_buffer else {}
        return pl.pallas_call(
            kernel,
            out_shape=jax.ShapeDtypeStruct((R, P), out_dtype),
            grid_spec=pltpu.PrefetchScalarGridSpec(
                num_scalar_prefetch=0,
                grid=(num_tiles,),
                in_specs=[
                    pl.BlockSpec((TR, H), lambda i: (i, 0)),              # x tile
                    pl.BlockSpec((H, M), lambda i: (0, 0), **resident),   # mlp W
                    pl.BlockSpec((1, M), lambda i: (0, 0), **resident),   # mlp b
                    pl.BlockSpec((M, P), lambda i: (0, 0), **resident),   # fused W
                    pl.BlockSpec((1, P), lambda i: (0, 0), **resident),   # fused b
                ],
                out_specs=pl.BlockSpec((TR, P), lambda i: (i, 0)),
            ),
            compiler_params=pltpu.CompilerParams(
                dimension_semantics=("parallel",),
                vmem_limit_bytes=vmem_bytes,
            ),
            cost_estimate=cost,
        )

    try:
        out = build(single_buffer_weights)(x2d, w1, b1, wcat, bcat)
    except Exception:
        # pipeline_mode=pl.Buffered(1) not supported by this JAX build:
        # fall back to default (double-buffered) resident blocks.
        if not single_buffer_weights:
            raise
        out = build(False)(x2d, w1, b1, wcat, bcat)

    # Under jit these slices fuse with downstream consumers; callers that want
    # zero extra passes can also consume the packed [R, P] slab directly
    # (padding columns are zero-filled, so reductions over it are safe).
    time_logits = out[:, 0:1].reshape(B, S, 1)
    mark_logits = out[:, 1:1 + E].reshape(B, S, E)
    base_intensity = packed["intensity_b"]                 # scalar parameter
    return time_logits, mark_logits, base_intensity


def init_params(key, hidden_dim, mlp_dim, num_event_types):
    """Deterministic init mirroring nn.Linear default (uniform +-1/sqrt(fan_in))."""
    k1, k2, k3, k4, k5, k6 = jax.random.split(key, 6)

    def lin(kw, kb, fan_in, fan_out):
        bound = 1.0 / jnp.sqrt(fan_in)
        w = jax.random.uniform(kw, (fan_in, fan_out), jnp.float32, -bound, bound)
        b = jax.random.uniform(kb, (fan_out,), jnp.float32, -bound, bound)
        return w, b

    mlp_w, mlp_b = lin(k1, k2, hidden_dim, mlp_dim)
    mark_w, mark_b = lin(k3, k4, mlp_dim, num_event_types)
    time_w, time_b = lin(k5, k6, mlp_dim, 1)
    return {
        "intensity_w": jnp.float32(0.1),
        "intensity_b": jnp.float32(0.1),
        "mlp_w": mlp_w, "mlp_b": mlp_b,
        "mark_w": mark_w, "mark_b": mark_b,
        "time_w": time_w, "time_b": time_b,
    }


def _reference(hidden_states, params):
    h = jax.nn.sigmoid(hidden_states @ params["mlp_w"] + params["mlp_b"])
    t = h @ params["time_w"] + params["time_b"]
    m = h @ params["mark_w"] + params["mark_b"]
    m = jax.nn.log_softmax(m, axis=-1)
    return t, m, params["intensity_b"]


if __name__ == "__main__":
    B, S, H, M, E = 2, 8, 32, 32, 4
    key = jax.random.PRNGKey(0)
    k_x, k_p = jax.random.split(key)
    hidden_states = jax.random.normal(k_x, (B, S, H), jnp.float32)
    params = init_params(k_p, H, M, E)

    t_ref, m_ref, b_ref = _reference(hidden_states, params)

    # f32 path: exact parity with the nn.Module numerics.
    packed_f32 = pack_decoder_params(params, compute_dtype=jnp.float32)
    t32, m32, bi = rmtpp_decoder_forward(hidden_states, packed_f32)
    jax.block_until_ready((t32, m32, bi))
    assert t32.shape == (B, S, 1)
    assert m32.shape == (B, S, E)
    assert jnp.allclose(t32, t_ref, atol=1e-5)
    assert jnp.allclose(m32, m_ref, atol=1e-5)
    assert jnp.allclose(bi, b_ref)

    # bf16 activation/weight path (production default): halves HBM read traffic.
    packed_bf16 = pack_decoder_params(params)              # compute_dtype=bf16
    t16, m16, _ = rmtpp_decoder_forward(hidden_states, packed_bf16)
    jax.block_until_ready((t16, m16))
    assert jnp.allclose(t16, t_ref, atol=5e-2, rtol=5e-2)
    assert jnp.allclose(m16, m_ref, atol=5e-2, rtol=5e-2)

    print("KERNEL_OK")
</pallas_src>

<mosaic_0001>
module attributes {stable_mosaic.version = 11 : i64} {
  func.func @rmtpp_decoder_kernel(%arg0: i32, %arg1: memref<8x32xf32, #tpu.memory_space<vmem>>, %arg2: memref<32x32xf32, #tpu.memory_space<vmem>>, %arg3: memref<1x32xf32, #tpu.memory_space<vmem>>, %arg4: memref<32x128xf32, #tpu.memory_space<vmem>>, %arg5: memref<1x128xf32, #tpu.memory_space<vmem>>, %arg6: memref<8x128xf32, #tpu.memory_space<vmem>>) attributes {dimension_semantics = [#tpu.dimension_semantics<parallel>], iteration_bounds = array<i64: 2>, scalar_prefetch = 0 : i64, scratch_operands = 0 : i64, tpu.core_type = #tpu.core_type<tc>, window_params = [{transform_indices = @transform_0, window_bounds = array<i64: 8, 32>}, {pipeline_mode = #tpu.pipeline_mode<synchronous>, transform_indices = @transform_1, window_bounds = array<i64: 32, 32>}, {pipeline_mode = #tpu.pipeline_mode<synchronous>, transform_indices = @transform_2, window_bounds = array<i64: 1, 32>}, {pipeline_mode = #tpu.pipeline_mode<synchronous>, transform_indices = @transform_3, window_bounds = array<i64: 32, 128>}, {pipeline_mode = #tpu.pipeline_mode<synchronous>, transform_indices = @transform_4, window_bounds = array<i64: 1, 128>}, {transform_indices = @transform_5, window_bounds = array<i64: 8, 128>}]} {
    %c0 = arith.constant 0 : index
    %c0_0 = arith.constant 0 : index
    %0 = vector.load %arg1[%c0, %c0_0] : memref<8x32xf32, #tpu.memory_space<vmem>>, vector<8x32xf32>
    %c0_1 = arith.constant 0 : index
    %c0_2 = arith.constant 0 : index
    %1 = vector.load %arg2[%c0_1, %c0_2] : memref<32x32xf32, #tpu.memory_space<vmem>>, vector<32x32xf32>
    %cst = arith.constant dense<0.000000e+00> : vector<8x32xf32>
    %2 = tpu.matmul %0, %1, %cst {dimension_numbers = #tpu.dot_dimension_numbers<[1], [0], [0], [1], [0, 0, 1, 1], [], []>} : vector<8x32xf32>, vector<32x32xf32>, vector<8x32xf32> -> vector<8x32xf32>
    %c0_3 = arith.constant 0 : index
    %c0_4 = arith.constant 0 : index
    %3 = vector.load %arg3[%c0_3, %c0_4] : memref<1x32xf32, #tpu.memory_space<vmem>>, vector<1x32xf32>
    %4 = vector.broadcast %3 : vector<1x32xf32> to vector<8x32xf32>
    %5 = arith.addf %2, %4 : vector<8x32xf32>
    %6 = arith.negf %5 : vector<8x32xf32>
    %7 = math.exp %6 : vector<8x32xf32>
    %cst_5 = arith.constant 1.000000e+00 : f32
    %8 = vector.broadcast %cst_5 : f32 to vector<8x32xf32>
    %9 = arith.addf %8, %7 : vector<8x32xf32>
    %10 = arith.divf %8, %9 : vector<8x32xf32>
    %c0_6 = arith.constant 0 : index
    %c0_7 = arith.constant 0 : index
    %11 = vector.load %arg4[%c0_6, %c0_7] : memref<32x128xf32, #tpu.memory_space<vmem>>, vector<32x128xf32>
    %cst_8 = arith.constant dense<0.000000e+00> : vector<8x128xf32>
    %12 = tpu.matmul %10, %11, %cst_8 {dimension_numbers = #tpu.dot_dimension_numbers<[1], [0], [0], [1], [0, 0, 1, 1], [], []>} : vector<8x32xf32>, vector<32x128xf32>, vector<8x128xf32> -> vector<8x128xf32>
    %c0_9 = arith.constant 0 : index
    %c0_10 = arith.constant 0 : index
    %13 = vector.load %arg5[%c0_9, %c0_10] : memref<1x128xf32, #tpu.memory_space<vmem>>, vector<1x128xf32>
    %14 = vector.broadcast %13 : vector<1x128xf32> to vector<8x128xf32>
    %15 = arith.addf %12, %14 : vector<8x128xf32>
    %16 = tpu.iota {dimensions = array<i32: 1>} : vector<8x128xi32>
    %c1_i32 = arith.constant 1 : i32
    %17 = vector.broadcast %c1_i32 : i32 to vector<8x128xi32>
    %18 = arith.cmpi sge, %16, %17 : vector<8x128xi32>
    %c4_i32 = arith.constant 4 : i32
    %19 = vector.broadcast %c4_i32 : i32 to vector<8x128xi32>
    %20 = arith.cmpi sle, %16, %19 : vector<8x128xi32>
    %21 = arith.andi %18, %20 : vector<8x128xi1>
    %cst_11 = arith.constant 0xFF800000 : f32
    %22 = vector.broadcast %cst_11 : f32 to vector<8x128xf32>
    %23 = arith.select %21, %15, %22 : vector<8x128xi1>, vector<8x128xf32>
    %cst_12 = arith.constant dense<0xFF800000> : vector<8xf32>
    %24 = vector.multi_reduction <maximumf>, %23, %cst_12 [1] : vector<8x128xf32> to vector<8xf32>
    %25 = vector.shape_cast %24 : vector<8xf32> to vector<8x1xf32>
    %26 = vector.broadcast %25 : vector<8x1xf32> to vector<8x128xf32>
    %27 = arith.subf %23, %26 : vector<8x128xf32>
    %28 = math.exp %27 : vector<8x128xf32>
    %cst_13 = arith.constant dense<0.000000e+00> : vector<8xf32>
    %29 = vector.multi_reduction <add>, %28, %cst_13 [1] : vector<8x128xf32> to vector<8xf32>
    %30 = vector.shape_cast %29 : vector<8xf32> to vector<8x1xf32>
    %31 = math.log %30 : vector<8x1xf32>
    %32 = vector.broadcast %31 : vector<8x1xf32> to vector<8x128xf32>
    %33 = arith.subf %27, %32 : vector<8x128xf32>
    %c0_i32 = arith.constant 0 : i32
    %34 = vector.broadcast %c0_i32 : i32 to vector<8x128xi32>
    %35 = arith.cmpi eq, %16, %34 : vector<8x128xi32>
    %cst_14 = arith.constant 0.000000e+00 : f32
    %36 = vector.broadcast %cst_14 : f32 to vector<8x128xf32>
    %37 = arith.select %21, %33, %36 : vector<8x128xi1>, vector<8x128xf32>
    %38 = arith.select %35, %15, %37 : vector<8x128xi1>, vector<8x128xf32>
    %c0_15 = arith.constant 0 : index
    %c0_16 = arith.constant 0 : index
    %39 = vector.load %arg6[%c0_15, %c0_16] : memref<8x128xf32, #tpu.memory_space<vmem>>, vector<8x128xf32>
    tpu.vector_store %arg6[%c0_15, %c0_16], %38 {strides = array<i32>} : memref<8x128xf32, #tpu.memory_space<vmem>>, vector<8x128xf32>,
    return
  }
  func.func @transform_0(%arg0: i32) -> (i32, i32) {
    %c0_i32 = arith.constant 0 : i32
    %c0_i32_0 = arith.constant 0 : i32
    return %arg0, %c0_i32 : i32, i32
  }
  func.func @transform_1(%arg0: i32) -> (i32, i32) {
    %c0_i32 = arith.constant 0 : i32
    %c0_i32_0 = arith.constant 0 : i32
    %c0_i32_1 = arith.constant 0 : i32
    return %c0_i32, %c0_i32_0 : i32, i32
  }
  func.func @transform_2(%arg0: i32) -> (i32, i32) {
    %c0_i32 = arith.constant 0 : i32
    %c0_i32_0 = arith.constant 0 : i32
    %c0_i32_1 = arith.constant 0 : i32
    return %c0_i32, %c0_i32_0 : i32, i32
  }
  func.func @transform_3(%arg0: i32) -> (i32, i32) {
    %c0_i32 = arith.constant 0 : i32
    %c0_i32_0 = arith.constant 0 : i32
    %c0_i32_1 = arith.constant 0 : i32
    return %c0_i32, %c0_i32_0 : i32, i32
  }
  func.func @transform_4(%arg0: i32) -> (i32, i32) {
    %c0_i32 = arith.constant 0 : i32
    %c0_i32_0 = arith.constant 0 : i32
    %c0_i32_1 = arith.constant 0 : i32
    return %c0_i32, %c0_i32_0 : i32, i32
  }
  func.func @transform_5(%arg0: i32) -> (i32, i32) {
    %c0_i32 = arith.constant 0 : i32
    %c0_i32_0 = arith.constant 0 : i32
    return %arg0, %c0_i32 : i32, i32
  }
}

module attributes {stable_mosaic.version = 11 : i64} {
  func.func @rmtpp_decoder_kernel(%arg0: i32, %arg1: memref<8x32xf32, #tpu.memory_space<vmem>>, %arg2: memref<32x32xf32, #tpu.memory_space<vmem>>, %arg3: memref<1x32xf32, #tpu.memory_space<vmem>>, %arg4: memref<32x128xf32, #tpu.memory_space<vmem>>, %arg5: memref<1x128xf32, #tpu.memory_space<vmem>>, %arg6: memref<8x128xf32, #tpu.memory_space<vmem>>) attributes {dimension_semantics = [#tpu.dimension_semantics<parallel>], iteration_bounds = array<i64: 2>, scalar_prefetch = 0 : i64, scratch_operands = 0 : i64, tpu.core_type = #tpu.core_type<tc>, window_params = [{transform_indices = @transform_0, window_bounds = array<i64: 8, 32>}, {pipeline_mode = #tpu.pipeline_mode<synchronous>, transform_indices = @transform_1, window_bounds = array<i64: 32, 32>}, {pipeline_mode = #tpu.pipeline_mode<synchronous>, transform_indices = @transform_2, window_bounds = array<i64: 1, 32>}, {pipeline_mode = #tpu.pipeline_mode<synchronous>, transform_indices = @transform_3, window_bounds = array<i64: 32, 128>}, {pipeline_mode = #tpu.pipeline_mode<synchronous>, transform_indices = @transform_4, window_bounds = array<i64: 1, 128>}, {transform_indices = @transform_5, window_bounds = array<i64: 8, 128>}]} {
    %c0 = arith.constant 0 : index
    %c0_0 = arith.constant 0 : index
    %0 = vector.load %arg1[%c0, %c0_0] : memref<8x32xf32, #tpu.memory_space<vmem>>, vector<8x32xf32>
    %c0_1 = arith.constant 0 : index
    %c0_2 = arith.constant 0 : index
    %1 = vector.load %arg2[%c0_1, %c0_2] : memref<32x32xf32, #tpu.memory_space<vmem>>, vector<32x32xf32>
    %cst = arith.constant dense<0.000000e+00> : vector<8x32xf32>
    %2 = tpu.matmul %0, %1, %cst {dimension_numbers = #tpu.dot_dimension_numbers<[1], [0], [0], [1], [0, 0, 1, 1], [], []>} : vector<8x32xf32>, vector<32x32xf32>, vector<8x32xf32> -> vector<8x32xf32>
    %c0_3 = arith.constant 0 : index
    %c0_4 = arith.constant 0 : index
    %3 = vector.load %arg3[%c0_3, %c0_4] : memref<1x32xf32, #tpu.memory_space<vmem>>, vector<1x32xf32>
    %4 = vector.broadcast %3 : vector<1x32xf32> to vector<8x32xf32>
    %5 = arith.addf %2, %4 : vector<8x32xf32>
    %6 = arith.negf %5 : vector<8x32xf32>
    %7 = math.exp %6 : vector<8x32xf32>
    %cst_5 = arith.constant 1.000000e+00 : f32
    %8 = vector.broadcast %cst_5 : f32 to vector<8x32xf32>
    %9 = arith.addf %8, %7 : vector<8x32xf32>
    %10 = arith.divf %8, %9 : vector<8x32xf32>
    %c0_6 = arith.constant 0 : index
    %c0_7 = arith.constant 0 : index
    %11 = vector.load %arg4[%c0_6, %c0_7] : memref<32x128xf32, #tpu.memory_space<vmem>>, vector<32x128xf32>
    %cst_8 = arith.constant dense<0.000000e+00> : vector<8x128xf32>
    %12 = tpu.matmul %10, %11, %cst_8 {dimension_numbers = #tpu.dot_dimension_numbers<[1], [0], [0], [1], [0, 0, 1, 1], [], []>} : vector<8x32xf32>, vector<32x128xf32>, vector<8x128xf32> -> vector<8x128xf32>
    %c0_9 = arith.constant 0 : index
    %c0_10 = arith.constant 0 : index
    %13 = vector.load %arg5[%c0_9, %c0_10] : memref<1x128xf32, #tpu.memory_space<vmem>>, vector<1x128xf32>
    %14 = vector.broadcast %13 : vector<1x128xf32> to vector<8x128xf32>
    %15 = arith.addf %12, %14 : vector<8x128xf32>
    %16 = tpu.iota {dimensions = array<i32: 1>} : vector<8x128xi32>
    %c1_i32 = arith.constant 1 : i32
    %17 = vector.broadcast %c1_i32 : i32 to vector<8x128xi32>
    %18 = arith.cmpi sge, %16, %17 : vector<8x128xi32>
    %c4_i32 = arith.constant 4 : i32
    %19 = vector.broadcast %c4_i32 : i32 to vector<8x128xi32>
    %20 = arith.cmpi sle, %16, %19 : vector<8x128xi32>
    %21 = arith.andi %18, %20 : vector<8x128xi1>
    %cst_11 = arith.constant 0xFF800000 : f32
    %22 = vector.broadcast %cst_11 : f32 to vector<8x128xf32>
    %23 = arith.select %21, %15, %22 : vector<8x128xi1>, vector<8x128xf32>
    %cst_12 = arith.constant dense<0xFF800000> : vector<8xf32>
    %24 = vector.multi_reduction <maximumf>, %23, %cst_12 [1] : vector<8x128xf32> to vector<8xf32>
    %25 = vector.shape_cast %24 : vector<8xf32> to vector<8x1xf32>
    %26 = vector.broadcast %25 : vector<8x1xf32> to vector<8x128xf32>
    %27 = arith.subf %23, %26 : vector<8x128xf32>
    %28 = math.exp %27 : vector<8x128xf32>
    %cst_13 = arith.constant dense<0.000000e+00> : vector<8xf32>
    %29 = vector.multi_reduction <add>, %28, %cst_13 [1] : vector<8x128xf32> to vector<8xf32>
    %30 = vector.shape_cast %29 : vector<8xf32> to vector<8x1xf32>
    %31 = math.log %30 : vector<8x1xf32>
    %32 = vector.broadcast %31 : vector<8x1xf32> to vector<8x128xf32>
    %33 = arith.subf %27, %32 : vector<8x128xf32>
    %c0_i32 = arith.constant 0 : i32
    %34 = vector.broadcast %c0_i32 : i32 to vector<8x128xi32>
    %35 = arith.cmpi eq, %16, %34 : vector<8x128xi32>
    %cst_14 = arith.constant 0.000000e+00 : f32
    %36 = vector.broadcast %cst_14 : f32 to vector<8x128xf32>
    %37 = arith.select %21, %33, %36 : vector<8x128xi1>, vector<8x128xf32>
    %38 = arith.select %35, %15, %37 : vector<8x128xi1>, vector<8x128xf32>
    %c0_15 = arith.constant 0 : index
    %c0_16 = arith.constant 0 : index
    %39 = vector.load %arg6[%c0_15, %c0_16] : memref<8x128xf32, #tpu.memory_space<vmem>>, vector<8x128xf32>
    tpu.vector_store %arg6[%c0_15, %c0_16], %38 {strides = array<i32>} : memref<8x128xf32, #tpu.memory_space<vmem>>, vector<8x128xf32>,
    return
  }
  func.func @transform_0(%arg0: i32) -> (i32, i32) {
    %c0_i32 = arith.constant 0 : i32
    %c0_i32_0 = arith.constant 0 : i32
    return %arg0, %c0_i32 : i32, i32
  }
  func.func @transform_1(%arg0: i32) -> (i32, i32) {
    %c0_i32 = arith.constant 0 : i32
    %c0_i32_0 = arith.constant 0 : i32
    %c0_i32_1 = arith.constant 0 : i32
    return %c0_i32, %c0_i32_0 : i32, i32
  }
  func.func @transform_2(%arg0: i32) -> (i32, i32) {
    %c0_i32 = arith.constant 0 : i32
    %c0_i32_0 = arith.constant 0 : i32
    %c0_i32_1 = arith.constant 0 : i32
    return %c0_i32, %c0_i32_0 : i32, i32
  }
  func.func @transform_3(%arg0: i32) -> (i32, i32) {
    %c0_i32 = arith.constant 0 : i32
    %c0_i32_0 = arith.constant 0 : i32
    %c0_i32_1 = arith.constant 0 : i32
    return %c0_i32, %c0_i32_0 : i32, i32
  }
  func.func @transform_4(%arg0: i32) -> (i32, i32) {
    %c0_i32 = arith.constant 0 : i32
    %c0_i32_0 = arith.constant 0 : i32
    %c0_i32_1 = arith.constant 0 : i32
    return %c0_i32, %c0_i32_0 : i32, i32
  }
  func.func @transform_5(%arg0: i32) -> (i32, i32) {
    %c0_i32 = arith.constant 0 : i32
    %c0_i32_0 = arith.constant 0 : i32
    return %arg0, %c0_i32 : i32, i32
  }
}

</mosaic_0001>

<bundles_post_ra>
// kernel: tpu_custom_call.1
= control target key start
LH: loop header
LB: loop body
LE: loop exit
PB: predicated region body
PF: predicated region fallthrough
CT: control target
= control target key end

     0   :  { %10 = vsyncpa [#allocation3], 0  ;;  %s1159_s0 = inlined_call_operand.hbm [shape: f32[16,32], index: 0, kind: input, shape index: {}]   ;;  %s1160_s1 = inlined_call_operand.hbm [shape: f32[32,32], index: 1, kind: input, shape index: {}]   ;;  %s1161_s2 = inlined_call_operand.vmem [shape: f32[1,32], index: 2, kind: input, shape index: {}]   ;;  %s1162_s3 = inlined_call_operand.hbm [shape: f32[32,128], index: 3, kind: input, shape index: {}]   ;;  %s1163_s4 = inlined_call_operand.vmem [shape: f32[1,128], index: 4, kind: input, shape index: {}]   ;;  %s1164_s5 = inlined_call_operand.hbm [shape: f32[16,128], index: 5, kind: output, shape index: {}]  }
   0x1   :  { %12 = vsyncpa [#allocation3 + $0x1], 0 }
   0x2   :  { %13 = vsyncpa [#allocation6], 0 }
   0x3   :  { %14 = vsyncpa [#allocation4], 0 }
   0x4   :  { %16 = vsyncpa [#allocation4 + $0x1], 0  ;;  %s910_s18 = smov 0   ;;  %s912_s19 = smov 0  }
   0x5   :  { %s914_s20 = smov 0   ;;  %s916_s21 = smov 0  }
   0x6 LB: > { %s931_s22 = sadd.s32 4294967295, %s869_s21   ;;  %s568_s23 = sadd.s32 4294967294, %s869_s21   ;;  %s869_s21 = sphi %s916_s21, %s1186_s21   ;;  %s865_s20 = sphi %s914_s20, %s1185_s20   ;;  %s861_s19 = sphi %s912_s19, %s1184_s19   ;;  %s857_s18 = sphi %s910_s18, %s1183_s18  }
   0x7   : > { %p42_p0 = scmp.ne.s32.totalorder %s861_s19, %s857_s18  ;;  %p1165_p1 = scmp.eq.s32.totalorder %s931_s22, 0 }
   0x8   : > { %p156_p3 = scmp.eq.s32.totalorder %s568_s23, 1  ;;  %p569_p5 = scmp.ge.s32.totalorder %s869_s21, 1 }
   0x9   : > { %p940_p4 = por %p1165_p1, %p42_p0  ;;  %p163_p7 = scmp.lt.s32.totalorder %s869_s21, 3 }
   0xa   : > { %p945_p6 = por %p156_p3, %p42_p0  ;;  %s871_s27 = smov [#allocation5]  }
   0xb   : > { %s1168_s24 = scalar_select %p940_p4, 1, 0 }
   0xc   : > { %s1169_s25 = scalar_select %p945_p6, 1, 0 }
   0xd   : > { %p950_p8 = pnand %p569_p5, %p163_p7  ;;  %s175_s28 = sshll.u32 %s871_s27, 4  ;;  %s954_s28 = int_to_ptr.vmem [resolvable:$true] %s175_s28 }
   0xe   : > { %s872_s30 = smov [#allocation7]   ;;  %s713_s9 = scalar_lea.hbm %s1160_s1, 512 }
   0xf   : > { %p645_p9 = pneg %p950_p8  ;;  %s191_s6 = sshll.u32 %s872_s30, 4  ;;  %s965_s6 = int_to_ptr.vmem [resolvable:$true] %s191_s6 }
  0x10   : > { %p714_p12 = scmp.ne.s32.totalorder %s1160_s1, %s713_s9  ;;  %p720_p5 = scmp.lt.u32.totalorder %s713_s9, %s1160_s1 }
  0x11   : > { %p961_p11 = pnand %p645_p9, %p1165_p1 }
  0x13   : > { %p715_p13 = pneg %p961_p11 }
  0x15   : > { %p716_p0 = pnand %p715_p13, %p714_p12 }
  0x17   : > { %p717_p3 = pneg %p716_p0 }
  0x19   : > { %p722_p7 = pnand %p720_p5, %p717_p3 }
  0x1b   : > { %725 = shalt.err (!%p722_p7)
}
  0x1c   : > { %s726_s14 = scalar_lea.vmem %s954_s28, 512  ;;  %p734_p2 = scmp.lt.s32.totalorder %s954_s28, %s954_s28 }
  0x1d   : > { %p727_p9 = scmp.ne.s32.totalorder %s954_s28, %s726_s14  ;;  %p735_p12 = scmp.lt.s32.totalorder %s726_s14, %s726_s14 }
  0x1f   : > { %p729_p10 = pnand %p727_p9, %p715_p13  ;;  %p736_p0 = por %p735_p12, %p734_p2 }
  0x21   : > { %p730_p1 = pneg %p729_p10 }
  0x23   : > { %p737_p6 = pnand %p736_p0, %p730_p1 }
  0x25   : > { %740 = shalt.err (!%p737_p6)
}
  0x26   : > { %s873_s15 = smov 128   ;;  %s874_s16 = smov 8  }
  0x27   : > { %648 = dma.hbm_to_vmem [thread:$0]  (!%p961_p11), %s1160_s1, 512, %s954_s28, [#allocation6], %s873_s15, %s873_s15, %s874_s16  }
  0x28   : > { %s741_s7 = scalar_lea.hbm %s1162_s3, 512 }
  0x29   : > { %p742_p2 = scmp.ne.s32.totalorder %s1162_s3, %s741_s7  ;;  %p748_p10 = scmp.lt.u32.totalorder %s741_s7, %s1162_s3 }
  0x2b   : > { %p744_p1 = pnand %p742_p2, %p715_p13 }
  0x2d   : > { %p745_p6 = pneg %p744_p1 }
  0x2f   : > { %p750_p3 = pnand %p748_p10, %p745_p6 }
  0x31   : > { %753 = shalt.err (!%p750_p3)
}
  0x32   : > { %s754_s28 = scalar_lea.vmem %s965_s6, 512  ;;  %p762_p12 = scmp.lt.s32.totalorder %s965_s6, %s965_s6 }
  0x33   : > { %p755_p5 = scmp.ne.s32.totalorder %s965_s6, %s754_s28  ;;  %p763_p0 = scmp.lt.s32.totalorder %s754_s28, %s754_s28 }
  0x35   : > { %p757_p7 = pnand %p755_p5, %p715_p13  ;;  %p764_p2 = por %p763_p0, %p762_p12 }
  0x37   : > { %p758_p9 = pneg %p757_p7 }
  0x39   : > { %p765_p1 = pnand %p764_p2, %p758_p9 }
  0x3b   : > { %768 = shalt.err (!%p765_p1)
}
  0x3c   : > { %651 = dma.hbm_to_vmem [thread:$0]  (!%p961_p11), %s1162_s3, 512, %s965_s6, [#allocation6], %s873_s15, %s873_s15, %s874_s16  }
  0x3d   : > { %s1020_s14 = sadd.s32 1, %s869_s21   ;;  %s29_s29 = sadd.s32 1, %s865_s20 }
  0x3e   : > { %s26_s17 = ssub.s32 %s869_s21, %s1020_s14  ;;  %p36_p13 = scmp.ne.s32.totalorder %s865_s20, %s861_s19 }
  0x3f   : > { %p27_p6 = scmp.eq.s32.totalorder %s26_s17, 0  ;;  %p37_p10 = scmp.eq.s32.totalorder %s869_s21, 0 }
  0x40   : > { %p1172_p3 = scmp.eq.s32.totalorder %s931_s22, 1  ;;  %p662_p7 = scmp.lt.s32.totalorder %s869_s21, 2 }
  0x41   : > { %s1036_s27 = scalar_select %p27_p6, %s865_s20, %s29_s29  }
  0x42   : > { %p1030_p5 = por %p1172_p3, %p36_p13  ;;  %p38_p9 = por %p37_p10, %p36_p13 }
  0x43   : > { %s208_s30 = sand.u32 1, %s865_s20   ;;  %s574_s6 = sshll.u32 %s869_s21, 7 }
  0x44   : > { %s1173_s23 = scalar_select %p1030_p5, 1, 0 }
  0x45   : > { %s573_s7 = sshll.u32 %s208_s30, 3  ;;  %s1043_s8 = scalar_lea.hbm %s1159_s0, %s574_s6 }
  0x46   : > { %s212_s9 = scalar_lea.vmem [#allocation2], %s573_s7  ;;  %p1047_p11 = pnand %p662_p7, %p38_p9 }
  0x47   : > { %s219_s10 = sshll.u32 %s212_s9, 4  ;;  %s209_s28 = scalar_lea.sflag [#allocation3], %s208_s30  ;;  %s1045_s10 = int_to_ptr.vmem [resolvable:$true] %s219_s10 }
  0x48   : > { %s769_s12 = scalar_lea.hbm %s1043_s8, 128  ;;  %p771_p0 = pneg %p1047_p11 }
  0x49   : > { %p770_p12 = scmp.ne.s32.totalorder %s1043_s8, %s769_s12  ;;  %s774_s17 = scalar_lea.hbm %s1159_s0, 256 }
  0x4a   : > { %p775_p13 = scmp.lt.u32.totalorder %s1043_s8, %s1159_s0  ;;  %p776_p6 = scmp.lt.u32.totalorder %s774_s17, %s769_s12 }
  0x4b   : > { %p772_p2 = pnand %p771_p0, %p770_p12  ;;  %p778_p3 = scmp.lt.u32.totalorder %s769_s12, %s1043_s8 }
  0x4c   : > { %p777_p10 = por %p776_p6, %p775_p13 }
  0x4d   : > { %p773_p1 = pneg %p772_p2 }
  0x4e   : > { %p779_p7 = por %p778_p3, %p777_p10 }
  0x50   : > { %p780_p9 = pnand %p779_p7, %p773_p1 }
  0x52   : > { %783 = shalt.err (!%p780_p9)
}
  0x53   : > { %s784_s30 = scalar_lea.vmem %s1045_s10, 128  ;;  %s875_s15 = smov [#allocation2]  }
  0x54   : > { %p785_p12 = scmp.ne.s32.totalorder %s1045_s10, %s784_s30  ;;  %s789_s16 = sshll.u32 %s875_s15, 4  ;;  %s790_s16 = int_to_ptr.vmem [resolvable:$false] %s789_s16 }
  0x55   : > { %s791_s9 = scalar_lea.vmem %s790_s16, 256  ;;  %p792_p4 = scmp.lt.s32.totalorder %s1045_s10, %s790_s16 }
  0x56   : > { %p787_p2 = pnand %p785_p12, %p771_p0  ;;  %p793_p13 = scmp.lt.s32.totalorder %s791_s9, %s784_s30 }
  0x58   : > { %p788_p5 = pneg %p787_p2  ;;  %p794_p6 = por %p793_p13, %p792_p4 }
  0x5a   : > { %p795_p10 = pnand %p794_p6, %p788_p5 }
  0x5c   : > { %798 = shalt.err (!%p795_p10)
}
  0x5d   : > { %655 = dma.hbm_to_vmem [thread:$0]  (!%p1047_p11), %s1043_s8, 128, %s1045_s10, %s209_s28  }
  0x5e   : > { %228 = sbr.rel (%p950_p8) target bundleno = 900 (0x384), region = 40  ;;  %s1079_s12 = sand.u32 (!%p950_p8), 1, %s861_s19  }
  0x5f   : > { %s576_s13 = sshll.u32 (!%p950_p8), %s1079_s12, 3  ;;  %s231_s29 = scalar_lea.sflag (!%p950_p8), [#allocation3], %s1079_s12 }
  0x60   : > { %s234_s17 = scalar_lea.vmem (!%p950_p8), [#allocation2], %s576_s13  ;;  %p1175_p4 = scmp.ne.s32.totalorder (!%p950_p8), %s1168_s24, 0 }
  0x65   : > { %844 = dma.done.wait (%p1175_p4), %s231_s29, 128  }
  0x66   : > { %846 = vsyncadd (%p1175_p4), %s231_s29, 4294967168  ;;  %p1176_p5 = scmp.eq.s32.totalorder %s931_s22, 0 }
  0x68   : > { %848 = dma.done.wait (%p1176_p5), [#allocation6], 1024   ;;  %p1177_p8 = pmov %p1176_p5 }
  0x69   : > { %v876_v0 = vmov 0.0|0.0   ;;  %vm877_vm0 = vmmov 0   ;;  %v878_v1 = vmov 0.0   ;;  %v270_v2 = vld [vmem:[#allocation5] sm:$0xff]  ;;  %v271_v3 = vld [vmem:[#allocation5 + $0x8] sm:$0xff]  ;;  %v272_v4 = vld [vmem:[#allocation5 + $0x10] sm:$0xff]  ;;  %v445_v23 = vlaneseq }
  0x6a   : > { %850 = vsyncadd (%p1177_p8), [#allocation6], 4294966272  ;;  %621 = vmatprep.subr.bf16.mxu0 %v876_v0  ;;  %607 = vmatprep.mubr.msk.f32.mxu0 %vm877_vm0, %v878_v1  ;;  %v622_v5 = vpack.c.bf16 %v271_v3, %v270_v2  ;;  %v273_v6 = vld [vmem:[#allocation5 + $0x18] sm:$0xff]  ;;  %vm281_vm1 = vcmask 261120   ;;  %v361_v9 = vld [vmem:[#allocation7] sm:$0xff]  ;;  %s586_s11 = sshll.u32 %s931_s22, 7 }
  0x6b   : > { %627 = vmatprep.subr.bf16.mxu1 %v876_v0  ;;  %618 = vmatprep.mubr.msk.f32.mxu1 %vm877_vm0, %v878_v1  ;;  %v625_v7 = vpack.c.bf16 %v273_v6, %v272_v4  ;;  %v269_v8 = vld [vmem:[%s234_s17] sm:$0xff]  ;;  %v362_v10 = vld [vmem:[#allocation7 + $0x8] sm:$0xff]  ;;  %v446_v24 = vand.u32 127, %v445_v23  ;;  %s268_s28 = scalar_lea.vmem [#allocation8], %s576_s13  ;;  %s1115_s15 = scalar_lea.hbm %s1164_s5, %s586_s11 }
  0x6c   : > { %623 = vmatpush3.bf16.msra.mxu0 %v622_v5  ;;  %v363_v11 = vld [vmem:[#allocation7 + $0x10] sm:$0xff]  ;;  %v628_v12 = vpack.c.bf16 %v362_v10, %v361_v9  ;;  %v364_v13 = vld [vmem:[#allocation7 + $0x18] sm:$0xff]  ;;  %s479_s7 = sshll.u32 %s268_s28, 4  ;;  %s466_s22 = scalar_lea.sflag [#allocation4], %s1079_s12  ;;  %s1117_s7 = int_to_ptr.vmem [resolvable:$true] %s479_s7 }
  0x6d   : > { %624 = vmatprep.subr.bf16.mxu0 %v876_v0  ;;  %v631_v14 = vpack.c.bf16 %v364_v13, %v363_v11  ;;  %v580_v15 = vld [vmem:[%s1161_s2] ss:$0 sm:$0xff]  ;;  %vm447_vm2 = vcmp.ge.s32.totalorder %v446_v24, 1  ;;  %vm448_vm3 = vcmp.le.s32.totalorder %v446_v24, 4  ;;  %vm461_vm5 = vcmp.eq.s32.totalorder %v446_v24, 0  ;;  %s799_s16 = scalar_lea.vmem %s1117_s7, 128 }
  0x6e   : > { %629 = vmatpush3.bf16.msra.mxu1 %v628_v12  ;;  %v583_v25 = vld [vmem:[%s1163_s4] ss:$0 sm:$0xff]  ;;  %vm1101_vm4 = vmand %vm447_vm2, %vm448_vm3  ;;  %p800_p11 = scmp.ne.s32.totalorder %s1117_s7, %s799_s16  ;;  %p1180_p0 = scmp.ne.s32.totalorder %s1173_s23, 0 }
  0x6f   : > { %630 = vmatprep.subr.bf16.mxu1 %v876_v0  ;;  %s879_s9 = smov [#allocation8]  }
  0x70   : > { %626 = vmatpush3.bf16.msra.mxu0 %v625_v7  ;;  %p801_p1 = pnand %p800_p11, %p1180_p0  ;;  %s803_s13 = sshll.u32 %s879_s9, 4  ;;  %s804_s13 = int_to_ptr.vmem [resolvable:$false] %s803_s13 }
  0x71   : > { %s805_s29 = scalar_lea.vmem %s804_s13, 256  ;;  %p806_p7 = scmp.lt.s32.totalorder %s1117_s7, %s804_s13 }
  0x72   : > { %632 = vmatpush3.bf16.msra.mxu1 %v631_v14  ;;  %p802_p3 = pneg %p801_p1  ;;  %p807_p9 = scmp.lt.s32.totalorder %s805_s29, %s799_s16 }
  0x73   : > { %608 = vmatmul.mubr.msk.f32.vlgmr.msra.gmra.mrb[0].mxu0 %vm281_vm1, %v269_v8 }
  0x74   : > { %p808_p12 = por %p807_p9, %p806_p7 }
  0x76   : > { %p809_p2 = pnand %p808_p12, %p802_p3 }
 0x146   : > { %v351_v16 = vpop.f32.mrb[0].mxu0 }
 0x147   : > { %v352_v17 = vadd.f32 %v580_v15, %v351_v16  ;;  %v609_v18 = vpop.f32.mrb[1].mxu0 }
 0x149   : > { %v582_v19 = vmul.f32 -1.442695, %v352_v17 }
 0x14b   : > { %705 = vpow2.f32 %v582_v19 }
 0x155   : > { %v706_v20 = vpop.eup %705 }
 0x156   : > { %v358_v21 = vadd.f32 1.0, %v706_v20 }
 0x158   : > { %707 = vrcp.f32 %v358_v21 }
 0x162   : > { %v708_v22 = vpop.eup %707 }
 0x163   : > { %619 = vmatmul.mubr.msk.f32.vlgmr.msra.gmra.mrb[0].mxu1 %vm281_vm1, %v708_v22 }
 0x236   : > { %v441_v26 = vpop.f32.mrb[0].mxu1 }
 0x237   : > { %v442_v28 = vadd.f32 %v583_v25, %v441_v26  ;;  %v620_v29 = vpop.f32.mrb[1].mxu1 }
 0x239   : > { %v450_v30 = vsel %vm1101_vm4, %v442_v28, -inf }
 0x23a   : > { %451 = vmax.xlane.f32.xlu0 %v450_v30 }
 0x2c7   : > { %v452_v31 = vpop.xlane.xlu0 %451 }
 0x2c8   : > { %v453_v32 = vsub.f32 %v450_v30, %v452_v31 }
 0x2ca   : > { %v454_v33 = vmul.f32 1.442695, %v453_v32 }
 0x2cc   : > { %709 = vpow2.f32 %v454_v33 }
 0x2d6   : > { %v710_v34 = vpop.eup %709 }
 0x2d7   : > { %456 = vadd.xlane.f32.xlu0 %v710_v34 }
 0x364   : > { %v457_v35 = vpop.xlane.xlu0 %456 }
 0x365   : > { %711 = vlog2.f32 %v457_v35 }
 0x36f   : > { %v712_v36 = vpop.eup %711 }
 0x370   : > { %v459_v37 = vmul.f32 0.6931472, %v712_v36 }
 0x372   : > { %v460_v38 = vsub.f32 %v453_v32, %v459_v37 }
 0x374   : > { %v462_v39 = vsel %vm1101_vm4, %v460_v38, 0.0 }
 0x375   : > { %v463_v40 = vsel %vm461_vm5, %v442_v28, %v462_v39 }
 0x376   : > { %464 = vst [vmem:[%s268_s28] sm:$0xff] %v463_v40 }
 0x377   : > { %812 = shalt.err (!%p809_p2)
}
 0x378   : > { %s813_s12 = scalar_lea.hbm %s1115_s15, 128  ;;  %s817_s26 = scalar_lea.hbm %s1164_s5, 256 }
 0x379   : > { %p814_p13 = scmp.ne.s32.totalorder %s1115_s15, %s813_s12  ;;  %p818_p4 = scmp.lt.u32.totalorder %s1115_s15, %s1164_s5 }
 0x37a   : > { %p819_p5 = scmp.lt.u32.totalorder %s817_s26, %s813_s12  ;;  %p821_p11 = scmp.lt.u32.totalorder %s813_s12, %s1115_s15 }
 0x37b   : > { %p815_p6 = pnand %p814_p13, %p1180_p0 }
 0x37c   : > { %p820_p8 = por %p819_p5, %p818_p4 }
 0x37d   : > { %p816_p10 = pneg %p815_p6 }
 0x37e   : > { %p822_p1 = por %p821_p11, %p820_p8 }
 0x380   : > { %p823_p3 = pnand %p822_p1, %p816_p10 }
 0x382   : > { %826 = shalt.err (!%p823_p3)
}
 0x383   : > { %643 = dma.vmem_to_hbm [thread:$0]  (%p1180_p0), %s1117_s7, 128, %s1115_s15, %s466_s22  }
 0x384 PF: > { %s491_s11 = sand.u32 1, %s857_s18   ;;  %p1181_p7 = scmp.ne.s32.totalorder %s1169_s25, 0 }
 0x385   : > { %p1182_p9 = scmp.ge.s32.totalorder %s869_s21, 2  ;;  %s492_s28 = scalar_lea.sflag [#allocation4], %s491_s11 }
 0x387   : > { %p657_p12 = pnand %p1182_p9, %p1181_p7 }
 0x389   : > { %852 = dma.done.wait (!%p657_p12), %s492_s28, 128  }
 0x38a   : > { %854 = vsyncadd (!%p657_p12), %s492_s28, 4294967168  ;;  %p19_p2 = scmp.ge.s32.totalorder %s1020_s14, 4   ;;  %s1183_s18 = smov %s861_s19 }
 0x38b   : > { %s1184_s19 = smov %s865_s20  ;;  %s1185_s20 = smov %s1036_s27 }
 0x38c   : > { %s1186_s21 = smov %s1020_s14  ;;  %21 = sbr.rel (!%p19_p2) target bundleno = 6 (0x6), region = 93 }
 0x393   :  { %497 = vsyncpa [#allocation3], 1 }
 0x394   :  { %499 = vsyncpa [#allocation3 + $0x1], 1 }
 0x395   :  { %500 = vsyncpa [#allocation6], 1 }
 0x396   :  { %501 = vsyncpa [#allocation4], 1 }
 0x397   :  { %503 = vsyncpa [#allocation4 + $0x1], 1 }

// kernel: tpu_custom_call.1
= control target key start
LH: loop header
LB: loop body
LE: loop exit
PB: predicated region body
PF: predicated region fallthrough
CT: control target
= control target key end

     0   :  { %10 = vsyncpa [#allocation3], 0  ;;  %s1159_s0 = inlined_call_operand.hbm [shape: f32[16,32], index: 0, kind: input, shape index: {}]   ;;  %s1160_s1 = inlined_call_operand.hbm [shape: f32[32,32], index: 1, kind: input, shape index: {}]   ;;  %s1161_s2 = inlined_call_operand.vmem [shape: f32[1,32], index: 2, kind: input, shape index: {}]   ;;  %s1162_s3 = inlined_call_operand.hbm [shape: f32[32,128], index: 3, kind: input, shape index: {}]   ;;  %s1163_s4 = inlined_call_operand.vmem [shape: f32[1,128], index: 4, kind: input, shape index: {}]   ;;  %s1164_s5 = inlined_call_operand.hbm [shape: f32[16,128], index: 5, kind: output, shape index: {}]  }
   0x1   :  { %12 = vsyncpa [#allocation3 + $0x1], 0 }
   0x2   :  { %13 = vsyncpa [#allocation6], 0 }
   0x3   :  { %14 = vsyncpa [#allocation4], 0 }
   0x4   :  { %16 = vsyncpa [#allocation4 + $0x1], 0  ;;  %s910_s18 = smov 0   ;;  %s912_s19 = smov 0  }
   0x5   :  { %s914_s20 = smov 0   ;;  %s916_s21 = smov 0  }
   0x6 LB: > { %s931_s22 = sadd.s32 4294967295, %s869_s21   ;;  %s568_s23 = sadd.s32 4294967294, %s869_s21   ;;  %s869_s21 = sphi %s916_s21, %s1186_s21   ;;  %s865_s20 = sphi %s914_s20, %s1185_s20   ;;  %s861_s19 = sphi %s912_s19, %s1184_s19   ;;  %s857_s18 = sphi %s910_s18, %s1183_s18  }
   0x7   : > { %p42_p0 = scmp.ne.s32.totalorder %s861_s19, %s857_s18  ;;  %p1165_p1 = scmp.eq.s32.totalorder %s931_s22, 0 }
   0x8   : > { %p156_p3 = scmp.eq.s32.totalorder %s568_s23, 1  ;;  %p569_p5 = scmp.ge.s32.totalorder %s869_s21, 1 }
   0x9   : > { %p940_p4 = por %p1165_p1, %p42_p0  ;;  %p163_p7 = scmp.lt.s32.totalorder %s869_s21, 3 }
   0xa   : > { %p945_p6 = por %p156_p3, %p42_p0  ;;  %s871_s27 = smov [#allocation5]  }
   0xb   : > { %s1168_s24 = scalar_select %p940_p4, 1, 0 }
   0xc   : > { %s1169_s25 = scalar_select %p945_p6, 1, 0 }
   0xd   : > { %p950_p8 = pnand %p569_p5, %p163_p7  ;;  %s175_s28 = sshll.u32 %s871_s27, 4  ;;  %s954_s28 = int_to_ptr.vmem [resolvable:$true] %s175_s28 }
   0xe   : > { %s872_s30 = smov [#allocation7]   ;;  %s713_s9 = scalar_lea.hbm %s1160_s1, 512 }
   0xf   : > { %p645_p9 = pneg %p950_p8  ;;  %s191_s6 = sshll.u32 %s872_s30, 4  ;;  %s965_s6 = int_to_ptr.vmem [resolvable:$true] %s191_s6 }
  0x10   : > { %p714_p12 = scmp.ne.s32.totalorder %s1160_s1, %s713_s9  ;;  %p720_p5 = scmp.lt.u32.totalorder %s713_s9, %s1160_s1 }
  0x11   : > { %p961_p11 = pnand %p645_p9, %p1165_p1 }
  0x13   : > { %p715_p13 = pneg %p961_p11 }
  0x15   : > { %p716_p0 = pnand %p715_p13, %p714_p12 }
  0x17   : > { %p717_p3 = pneg %p716_p0 }
  0x19   : > { %p722_p7 = pnand %p720_p5, %p717_p3 }
  0x1b   : > { %725 = shalt.err (!%p722_p7)
}
  0x1c   : > { %s726_s14 = scalar_lea.vmem %s954_s28, 512  ;;  %p734_p2 = scmp.lt.s32.totalorder %s954_s28, %s954_s28 }
  0x1d   : > { %p727_p9 = scmp.ne.s32.totalorder %s954_s28, %s726_s14  ;;  %p735_p12 = scmp.lt.s32.totalorder %s726_s14, %s726_s14 }
  0x1f   : > { %p729_p10 = pnand %p727_p9, %p715_p13  ;;  %p736_p0 = por %p735_p12, %p734_p2 }
  0x21   : > { %p730_p1 = pneg %p729_p10 }
  0x23   : > { %p737_p6 = pnand %p736_p0, %p730_p1 }
  0x25   : > { %740 = shalt.err (!%p737_p6)
}
  0x26   : > { %s873_s15 = smov 128   ;;  %s874_s16 = smov 8  }
  0x27   : > { %648 = dma.hbm_to_vmem [thread:$0]  (!%p961_p11), %s1160_s1, 512, %s954_s28, [#allocation6], %s873_s15, %s873_s15, %s874_s16  }
  0x28   : > { %s741_s7 = scalar_lea.hbm %s1162_s3, 512 }
  0x29   : > { %p742_p2 = scmp.ne.s32.totalorder %s1162_s3, %s741_s7  ;;  %p748_p10 = scmp.lt.u32.totalorder %s741_s7, %s1162_s3 }
  0x2b   : > { %p744_p1 = pnand %p742_p2, %p715_p13 }
  0x2d   : > { %p745_p6 = pneg %p744_p1 }
  0x2f   : > { %p750_p3 = pnand %p748_p10, %p745_p6 }
  0x31   : > { %753 = shalt.err (!%p750_p3)
}
  0x32   : > { %s754_s28 = scalar_lea.vmem %s965_s6, 512  ;;  %p762_p12 = scmp.lt.s32.totalorder %s965_s6, %s965_s6 }
  0x33   : > { %p755_p5 = scmp.ne.s32.totalorder %s965_s6, %s754_s28  ;;  %p763_p0 = scmp.lt.s32.totalorder %s754_s28, %s754_s28 }
  0x35   : > { %p757_p7 = pnand %p755_p5, %p715_p13  ;;  %p764_p2 = por %p763_p0, %p762_p12 }
  0x37   : > { %p758_p9 = pneg %p757_p7 }
  0x39   : > { %p765_p1 = pnand %p764_p2, %p758_p9 }
  0x3b   : > { %768 = shalt.err (!%p765_p1)
}
  0x3c   : > { %651 = dma.hbm_to_vmem [thread:$0]  (!%p961_p11), %s1162_s3, 512, %s965_s6, [#allocation6], %s873_s15, %s873_s15, %s874_s16  }
  0x3d   : > { %s1020_s14 = sadd.s32 1, %s869_s21   ;;  %s29_s29 = sadd.s32 1, %s865_s20 }
  0x3e   : > { %s26_s17 = ssub.s32 %s869_s21, %s1020_s14  ;;  %p36_p13 = scmp.ne.s32.totalorder %s865_s20, %s861_s19 }
  0x3f   : > { %p27_p6 = scmp.eq.s32.totalorder %s26_s17, 0  ;;  %p37_p10 = scmp.eq.s32.totalorder %s869_s21, 0 }
  0x40   : > { %p1172_p3 = scmp.eq.s32.totalorder %s931_s22, 1  ;;  %p662_p7 = scmp.lt.s32.totalorder %s869_s21, 2 }
  0x41   : > { %s1036_s27 = scalar_select %p27_p6, %s865_s20, %s29_s29  }
  0x42   : > { %p1030_p5 = por %p1172_p3, %p36_p13  ;;  %p38_p9 = por %p37_p10, %p36_p13 }
  0x43   : > { %s208_s30 = sand.u32 1, %s865_s20   ;;  %s574_s6 = sshll.u32 %s869_s21, 7 }
  0x44   : > { %s1173_s23 = scalar_select %p1030_p5, 1, 0 }
  0x45   : > { %s573_s7 = sshll.u32 %s208_s30, 3  ;;  %s1043_s8 = scalar_lea.hbm %s1159_s0, %s574_s6 }
  0x46   : > { %s212_s9 = scalar_lea.vmem [#allocation2], %s573_s7  ;;  %p1047_p11 = pnand %p662_p7, %p38_p9 }
  0x47   : > { %s219_s10 = sshll.u32 %s212_s9, 4  ;;  %s209_s28 = scalar_lea.sflag [#allocation3], %s208_s30  ;;  %s1045_s10 = int_to_ptr.vmem [resolvable:$true] %s219_s10 }
  0x48   : > { %s769_s12 = scalar_lea.hbm %s1043_s8, 128  ;;  %p771_p0 = pneg %p1047_p11 }
  0x49   : > { %p770_p12 = scmp.ne.s32.totalorder %s1043_s8, %s769_s12  ;;  %s774_s17 = scalar_lea.hbm %s1159_s0, 256 }
  0x4a   : > { %p775_p13 = scmp.lt.u32.totalorder %s1043_s8, %s1159_s0  ;;  %p776_p6 = scmp.lt.u32.totalorder %s774_s17, %s769_s12 }
  0x4b   : > { %p772_p2 = pnand %p771_p0, %p770_p12  ;;  %p778_p3 = scmp.lt.u32.totalorder %s769_s12, %s1043_s8 }
  0x4c   : > { %p777_p10 = por %p776_p6, %p775_p13 }
  0x4d   : > { %p773_p1 = pneg %p772_p2 }
  0x4e   : > { %p779_p7 = por %p778_p3, %p777_p10 }
  0x50   : > { %p780_p9 = pnand %p779_p7, %p773_p1 }
  0x52   : > { %783 = shalt.err (!%p780_p9)
}
  0x53   : > { %s784_s30 = scalar_lea.vmem %s1045_s10, 128  ;;  %s875_s15 = smov [#allocation2]  }
  0x54   : > { %p785_p12 = scmp.ne.s32.totalorder %s1045_s10, %s784_s30  ;;  %s789_s16 = sshll.u32 %s875_s15, 4  ;;  %s790_s16 = int_to_ptr.vmem [resolvable:$false] %s789_s16 }
  0x55   : > { %s791_s9 = scalar_lea.vmem %s790_s16, 256  ;;  %p792_p4 = scmp.lt.s32.totalorder %s1045_s10, %s790_s16 }
  0x56   : > { %p787_p2 = pnand %p785_p12, %p771_p0  ;;  %p793_p13 = scmp.lt.s32.totalorder %s791_s9, %s784_s30 }
  0x58   : > { %p788_p5 = pneg %p787_p2  ;;  %p794_p6 = por %p793_p13, %p792_p4 }
  0x5a   : > { %p795_p10 = pnand %p794_p6, %p788_p5 }
  0x5c   : > { %798 = shalt.err (!%p795_p10)
}
  0x5d   : > { %655 = dma.hbm_to_vmem [thread:$0]  (!%p1047_p11), %s1043_s8, 128, %s1045_s10, %s209_s28  }
  0x5e   : > { %228 = sbr.rel (%p950_p8) target bundleno = 900 (0x384), region = 40  ;;  %s1079_s12 = sand.u32 (!%p950_p8), 1, %s861_s19  }
  0x5f   : > { %s576_s13 = sshll.u32 (!%p950_p8), %s1079_s12, 3  ;;  %s231_s29 = scalar_lea.sflag (!%p950_p8), [#allocation3], %s1079_s12 }
  0x60   : > { %s234_s17 = scalar_lea.vmem (!%p950_p8), [#allocation2], %s576_s13  ;;  %p1175_p4 = scmp.ne.s32.totalorder (!%p950_p8), %s1168_s24, 0 }
  0x65   : > { %844 = dma.done.wait (%p1175_p4), %s231_s29, 128  }
  0x66   : > { %846 = vsyncadd (%p1175_p4), %s231_s29, 4294967168  ;;  %p1176_p5 = scmp.eq.s32.totalorder %s931_s22, 0 }
  0x68   : > { %848 = dma.done.wait (%p1176_p5), [#allocation6], 1024   ;;  %p1177_p8 = pmov %p1176_p5 }
  0x69   : > { %v876_v0 = vmov 0.0|0.0   ;;  %vm877_vm0 = vmmov 0   ;;  %v878_v1 = vmov 0.0   ;;  %v270_v2 = vld [vmem:[#allocation5] sm:$0xff]  ;;  %v271_v3 = vld [vmem:[#allocation5 + $0x8] sm:$0xff]  ;;  %v272_v4 = vld [vmem:[#allocation5 + $0x10] sm:$0xff]  ;;  %v445_v23 = vlaneseq }
  0x6a   : > { %850 = vsyncadd (%p1177_p8), [#allocation6], 4294966272  ;;  %621 = vmatprep.subr.bf16.mxu0 %v876_v0  ;;  %607 = vmatprep.mubr.msk.f32.mxu0 %vm877_vm0, %v878_v1  ;;  %v622_v5 = vpack.c.bf16 %v271_v3, %v270_v2  ;;  %v273_v6 = vld [vmem:[#allocation5 + $0x18] sm:$0xff]  ;;  %vm281_vm1 = vcmask 261120   ;;  %v361_v9 = vld [vmem:[#allocation7] sm:$0xff]  ;;  %s586_s11 = sshll.u32 %s931_s22, 7 }
  0x6b   : > { %627 = vmatprep.subr.bf16.mxu1 %v876_v0  ;;  %618 = vmatprep.mubr.msk.f32.mxu1 %vm877_vm0, %v878_v1  ;;  %v625_v7 = vpack.c.bf16 %v273_v6, %v272_v4  ;;  %v269_v8 = vld [vmem:[%s234_s17] sm:$0xff]  ;;  %v362_v10 = vld [vmem:[#allocation7 + $0x8] sm:$0xff]  ;;  %v446_v24 = vand.u32 127, %v445_v23  ;;  %s268_s28 = scalar_lea.vmem [#allocation8], %s576_s13  ;;  %s1115_s15 = scalar_lea.hbm %s1164_s5, %s586_s11 }
  0x6c   : > { %623 = vmatpush3.bf16.msra.mxu0 %v622_v5  ;;  %v363_v11 = vld [vmem:[#allocation7 + $0x10] sm:$0xff]  ;;  %v628_v12 = vpack.c.bf16 %v362_v10, %v361_v9  ;;  %v364_v13 = vld [vmem:[#allocation7 + $0x18] sm:$0xff]  ;;  %s479_s7 = sshll.u32 %s268_s28, 4  ;;  %s466_s22 = scalar_lea.sflag [#allocation4], %s1079_s12  ;;  %s1117_s7 = int_to_ptr.vmem [resolvable:$true] %s479_s7 }
  0x6d   : > { %624 = vmatprep.subr.bf16.mxu0 %v876_v0  ;;  %v631_v14 = vpack.c.bf16 %v364_v13, %v363_v11  ;;  %v580_v15 = vld [vmem:[%s1161_s2] ss:$0 sm:$0xff]  ;;  %vm447_vm2 = vcmp.ge.s32.totalorder %v446_v24, 1  ;;  %vm448_vm3 = vcmp.le.s32.totalorder %v446_v24, 4  ;;  %vm461_vm5 = vcmp.eq.s32.totalorder %v446_v24, 0  ;;  %s799_s16 = scalar_lea.vmem %s1117_s7, 128 }
  0x6e   : > { %629 = vmatpush3.bf16.msra.mxu1 %v628_v12  ;;  %v583_v25 = vld [vmem:[%s1163_s4] ss:$0 sm:$0xff]  ;;  %vm1101_vm4 = vmand %vm447_vm2, %vm448_vm3  ;;  %p800_p11 = scmp.ne.s32.totalorder %s1117_s7, %s799_s16  ;;  %p1180_p0 = scmp.ne.s32.totalorder %s1173_s23, 0 }
  0x6f   : > { %630 = vmatprep.subr.bf16.mxu1 %v876_v0  ;;  %s879_s9 = smov [#allocation8]  }
  0x70   : > { %626 = vmatpush3.bf16.msra.mxu0 %v625_v7  ;;  %p801_p1 = pnand %p800_p11, %p1180_p0  ;;  %s803_s13 = sshll.u32 %s879_s9, 4  ;;  %s804_s13 = int_to_ptr.vmem [resolvable:$false] %s803_s13 }
  0x71   : > { %s805_s29 = scalar_lea.vmem %s804_s13, 256  ;;  %p806_p7 = scmp.lt.s32.totalorder %s1117_s7, %s804_s13 }
  0x72   : > { %632 = vmatpush3.bf16.msra.mxu1 %v631_v14  ;;  %p802_p3 = pneg %p801_p1  ;;  %p807_p9 = scmp.lt.s32.totalorder %s805_s29, %s799_s16 }
  0x73   : > { %608 = vmatmul.mubr.msk.f32.vlgmr.msra.gmra.mrb[0].mxu0 %vm281_vm1, %v269_v8 }
  0x74   : > { %p808_p12 = por %p807_p9, %p806_p7 }
  0x76   : > { %p809_p2 = pnand %p808_p12, %p802_p3 }
 0x146   : > { %v351_v16 = vpop.f32.mrb[0].mxu0 }
 0x147   : > { %v352_v17 = vadd.f32 %v580_v15, %v351_v16  ;;  %v609_v18 = vpop.f32.mrb[1].mxu0 }
 0x149   : > { %v582_v19 = vmul.f32 -1.442695, %v352_v17 }
 0x14b   : > { %705 = vpow2.f32 %v582_v19 }
 0x155   : > { %v706_v20 = vpop.eup %705 }
 0x156   : > { %v358_v21 = vadd.f32 1.0, %v706_v20 }
 0x158   : > { %707 = vrcp.f32 %v358_v21 }
 0x162   : > { %v708_v22 = vpop.eup %707 }
 0x163   : > { %619 = vmatmul.mubr.msk.f32.vlgmr.msra.gmra.mrb[0].mxu1 %vm281_vm1, %v708_v22 }
 0x236   : > { %v441_v26 = vpop.f32.mrb[0].mxu1 }
 0x237   : > { %v442_v28 = vadd.f32 %v583_v25, %v441_v26  ;;  %v620_v29 = vpop.f32.mrb[1].mxu1 }
 0x239   : > { %v450_v30 = vsel %vm1101_vm4, %v442_v28, -inf }
 0x23a   : > { %451 = vmax.xlane.f32.xlu0 %v450_v30 }
 0x2c7   : > { %v452_v31 = vpop.xlane.xlu0 %451 }
 0x2c8   : > { %v453_v32 = vsub.f32 %v450_v30, %v452_v31 }
 0x2ca   : > { %v454_v33 = vmul.f32 1.442695, %v453_v32 }
 0x2cc   : > { %709 = vpow2.f32 %v454_v33 }
 0x2d6   : > { %v710_v34 = vpop.eup %709 }
 0x2d7   : > { %456 = vadd.xlane.f32.xlu0 %v710_v34 }
 0x364   : > { %v457_v35 = vpop.xlane.xlu0 %456 }
 0x365   : > { %711 = vlog2.f32 %v457_v35 }
 0x36f   : > { %v712_v36 = vpop.eup %711 }
 0x370   : > { %v459_v37 = vmul.f32 0.6931472, %v712_v36 }
 0x372   : > { %v460_v38 = vsub.f32 %v453_v32, %v459_v37 }
 0x374   : > { %v462_v39 = vsel %vm1101_vm4, %v460_v38, 0.0 }
 0x375   : > { %v463_v40 = vsel %vm461_vm5, %v442_v28, %v462_v39 }
 0x376   : > { %464 = vst [vmem:[%s268_s28] sm:$0xff] %v463_v40 }
 0x377   : > { %812 = shalt.err (!%p809_p2)
}
 0x378   : > { %s813_s12 = scalar_lea.hbm %s1115_s15, 128  ;;  %s817_s26 = scalar_lea.hbm %s1164_s5, 256 }
 0x379   : > { %p814_p13 = scmp.ne.s32.totalorder %s1115_s15, %s813_s12  ;;  %p818_p4 = scmp.lt.u32.totalorder %s1115_s15, %s1164_s5 }
 0x37a   : > { %p819_p5 = scmp.lt.u32.totalorder %s817_s26, %s813_s12  ;;  %p821_p11 = scmp.lt.u32.totalorder %s813_s12, %s1115_s15 }
 0x37b   : > { %p815_p6 = pnand %p814_p13, %p1180_p0 }
 0x37c   : > { %p820_p8 = por %p819_p5, %p818_p4 }
 0x37d   : > { %p816_p10 = pneg %p815_p6 }
 0x37e   : > { %p822_p1 = por %p821_p11, %p820_p8 }
 0x380   : > { %p823_p3 = pnand %p822_p1, %p816_p10 }
 0x382   : > { %826 = shalt.err (!%p823_p3)
}
 0x383   : > { %643 = dma.vmem_to_hbm [thread:$0]  (%p1180_p0), %s1117_s7, 128, %s1115_s15, %s466_s22  }
 0x384 PF: > { %s491_s11 = sand.u32 1, %s857_s18   ;;  %p1181_p7 = scmp.ne.s32.totalorder %s1169_s25, 0 }
 0x385   : > { %p1182_p9 = scmp.ge.s32.totalorder %s869_s21, 2  ;;  %s492_s28 = scalar_lea.sflag [#allocation4], %s491_s11 }
 0x387   : > { %p657_p12 = pnand %p1182_p9, %p1181_p7 }
 0x389   : > { %852 = dma.done.wait (!%p657_p12), %s492_s28, 128  }
 0x38a   : > { %854 = vsyncadd (!%p657_p12), %s492_s28, 4294967168  ;;  %p19_p2 = scmp.ge.s32.totalorder %s1020_s14, 4   ;;  %s1183_s18 = smov %s861_s19 }
 0x38b   : > { %s1184_s19 = smov %s865_s20  ;;  %s1185_s20 = smov %s1036_s27 }
 0x38c   : > { %s1186_s21 = smov %s1020_s14  ;;  %21 = sbr.rel (!%p19_p2) target bundleno = 6 (0x6), region = 93 }
 0x393   :  { %497 = vsyncpa [#allocation3], 1 }
 0x394   :  { %499 = vsyncpa [#allocation3 + $0x1], 1 }
 0x395   :  { %500 = vsyncpa [#allocation6], 1 }
 0x396   :  { %501 = vsyncpa [#allocation4], 1 }
 0x397   :  { %503 = vsyncpa [#allocation4 + $0x1], 1 }

</bundles_post_ra>
